<compile_context>
chip_gen: v5e
topology: v5e:2x2
jax: 0.10.0
libtpu: 0.0.40
codegen_flags: <defaults>
</compile_context>

<pallas_src>
import jax
import jax.numpy as jnp
from jax.experimental import pallas as pl
from jax.experimental.pallas import tpu as pltpu


def _round_up(x, m):
    return (x + m - 1) // m * m


# Contract dim 1 of both operands: [tm, K] x [N, K] -> [tm, N]  (== x @ W.T with
# W kept in the PyTorch [out, in] layout -> no wrapper-side transpose pass).
_NT_DIMS = (((1,), (1,)), ((), ()))


# ---------------------------------------------------------------------------
# Kernels
# ---------------------------------------------------------------------------
def _faa_resident_kernel(x_ref, xsa_ref, xga_ref,
                         w_sa_ref, b_sa_ref, w_ga_ref, b_ga_ref,
                         out_sa_ref, out_ga_ref):
    # Elementwise gating on the VPU, then bf16 operands for the MXU.
    x = x_ref[...]
    sa_in = (x * xsa_ref[...]).astype(jnp.bfloat16)
    ga_in = (x * xga_ref[...]).astype(jnp.bfloat16)
    w_sa = w_sa_ref[...].astype(jnp.bfloat16)
    w_ga = w_ga_ref[...].astype(jnp.bfloat16)

    # Two Linear layers: bf16 MXU operands, f32 accumulation, f32 epilogue.
    a_logit = jax.lax.dot_general(sa_in, w_sa, _NT_DIMS,
                                  preferred_element_type=jnp.float32)
    g_logit = jax.lax.dot_general(ga_in, w_ga, _NT_DIMS,
                                  preferred_element_type=jnp.float32)
    a = jax.nn.sigmoid(a_logit + b_sa_ref[...].astype(jnp.float32))
    g = jax.nn.sigmoid(g_logit + b_ga_ref[...].astype(jnp.float32))

    # softmax over the 2-element pair == sigmoid of the difference (exact):
    #   exp(a) / (exp(a) + exp(g)) = sigmoid(a - g)
    w_pair = jax.nn.sigmoid(a - g)
    out_sa_ref[...] = w_pair.astype(out_sa_ref.dtype)
    out_ga_ref[...] = (1.0 - w_pair).astype(out_ga_ref.dtype)


def _faa_ktiled_kernel(x_ref, xsa_ref, xga_ref,
                       w_sa_ref, b_sa_ref, w_ga_ref, b_ga_ref,
                       out_sa_ref, out_ga_ref,
                       acc_a_ref, acc_g_ref):
    k = pl.program_id(1)

    @pl.when(k == 0)
    def _init():
        acc_a_ref[...] = jnp.zeros_like(acc_a_ref)
        acc_g_ref[...] = jnp.zeros_like(acc_g_ref)

    x = x_ref[...]
    sa_in = (x * xsa_ref[...]).astype(jnp.bfloat16)
    ga_in = (x * xga_ref[...]).astype(jnp.bfloat16)
    acc_a_ref[...] += jax.lax.dot_general(sa_in, w_sa_ref[...], _NT_DIMS,
                                          preferred_element_type=jnp.float32)
    acc_g_ref[...] += jax.lax.dot_general(ga_in, w_ga_ref[...], _NT_DIMS,
                                          preferred_element_type=jnp.float32)

    @pl.when(k == pl.num_programs(1) - 1)
    def _finalize():
        a = jax.nn.sigmoid(acc_a_ref[...] + b_sa_ref[...].astype(jnp.float32))
        g = jax.nn.sigmoid(acc_g_ref[...] + b_ga_ref[...].astype(jnp.float32))
        w_pair = jax.nn.sigmoid(a - g)
        out_sa_ref[...] = w_pair.astype(out_sa_ref.dtype)
        out_ga_ref[...] = (1.0 - w_pair).astype(out_ga_ref.dtype)


# ---------------------------------------------------------------------------
# Tiling / VMEM heuristics
# ---------------------------------------------------------------------------
def _vmem_budget_bytes():
    """Generation-aware VMEM budget: ~48 MiB on v7x (64 MiB physical per TC),
    ~96 MiB on v5e/v6e (128 MiB physical)."""
    cap = 128 * 1024 * 1024
    try:
        cap = int(getattr(pltpu.get_tpu_info(), "vmem_capacity_bytes", cap)) or cap
    except Exception:
        pass
    if cap <= 64 * 1024 * 1024:
        return min(48 * 1024 * 1024, cap * 3 // 4), cap
    return min(96 * 1024 * 1024, cap * 3 // 4), cap


def _resident_vmem_estimate(rows, H, in_isz, out_isz):
    """Conservative VMEM footprint of the resident-weight kernel, including the
    f32 epilogue temporaries (logits / sigmoids / bf16 casts)."""
    Hl = _round_up(H, 128)                 # lane padding inside VMEM
    r = _round_up(rows, 8)                 # sublane padding
    w = 2 * 2 * _round_up(H, 8) * Hl * 4   # 2 f32 weights, double-buffered
    b = 2 * 2 * 8 * Hl * 4                 # 2 biases, double-buffered
    x_in = 3 * 2 * r * Hl * in_isz         # 3 row inputs, double-buffered
    outs = 2 * 2 * r * Hl * out_isz        # 2 row outputs, double-buffered
    tmp = (2 * r * Hl * 2                  # bf16 gated inputs
           + 2 * _round_up(H, 8) * Hl * 2  # bf16 weight casts
           + 6 * r * Hl * 4)               # f32 logits / sigmoids / result
    return w + b + x_in + outs + tmp


def _choose_row_tile(M, H, in_isz, out_isz, budget):
    # Target >= ~4 MiB of streamed HBM bytes per grid step (3 inputs + 2 outputs).
    bytes_per_row = H * (3 * in_isz + 2 * out_isz)
    tm = _round_up(pl.cdiv(4 * 1024 * 1024, max(bytes_per_row, 1)), 128)
    tm = max(128, min(tm, 4096))
    # Keep >= 2 grid steps when there is enough work (v7x: 2 TensorCores).
    if M > 256:
        tm = min(tm, _round_up(pl.cdiv(M, 2), 128))
    while tm > 128 and _resident_vmem_estimate(tm, H, in_isz, out_isz) > budget:
        tm -= 128
    if M <= tm:
        tm = M        # single full-extent row block (exempt from the 8-row rule)
    return tm


def _ktiled_vmem_estimate(rows, H, tk, in_isz, out_isz):
    Hl = _round_up(H, 128)
    r = _round_up(rows, 8)
    w = 2 * 2 * _round_up(H, 8) * tk * 2   # bf16 weight K-slices, double-buffered
    b = 2 * 2 * 8 * Hl * 4
    x_in = 3 * 2 * r * tk * in_isz
    outs = 2 * 2 * r * Hl * out_isz
    acc = 2 * r * Hl * 4
    tmp = 2 * r * tk * 2 + 6 * r * Hl * 4
    return w + b + x_in + outs + acc + tmp


def _choose_ktiled_sizes(M, H, K_pad, in_isz, out_isz, budget, tile_k=None):
    if tile_k is not None and tile_k % 128 == 0 and K_pad % tile_k == 0:
        tk = int(tile_k)
    else:
        tk = next(c for c in (512, 256, 128) if K_pad % c == 0)
    tm = 512
    if M > 256:
        tm = min(tm, _round_up(pl.cdiv(M, 2), 128))
    while tm > 128 and _ktiled_vmem_estimate(tm, H, tk, in_isz, out_isz) > budget:
        tm -= 128
    if M <= tm:
        tm = M
    return tm, tk


# ---------------------------------------------------------------------------
# Forward wrapper
# ---------------------------------------------------------------------------
def faa_forward(x, x_SA, x_GA, w_sa, b_sa, w_ga, b_ga, *,
                out_dtype=None, force_ktiled=False, tile_k=None):
    """FAA forward.

    x, x_SA, x_GA : [B, S, H]
    w_sa, w_ga    : [H, H]  (PyTorch nn.Linear [out, in] layout, NOT transposed)
    b_sa, b_ga    : [H]
    Returns (fcd_x_SA, fcd_x_GA), each [B, S, H].
    """
    B, S, H = x.shape
    M = B * S
    out_dtype = x.dtype if out_dtype is None else jnp.dtype(out_dtype)
    in_isz = jnp.dtype(x.dtype).itemsize
    out_isz = jnp.dtype(out_dtype).itemsize
    budget, _ = _vmem_budget_bytes()

    # Free reshapes only — no padding / copying of the data path.
    xf = x.reshape(M, H)
    xsaf = x_SA.reshape(M, H)
    xgaf = x_GA.reshape(M, H)
    b_sa2 = jnp.asarray(b_sa).reshape(1, H)
    b_ga2 = jnp.asarray(b_ga).reshape(1, H)
    w_sa = jnp.asarray(w_sa)
    w_ga = jnp.asarray(w_ga)

    out_shape = (jax.ShapeDtypeStruct((M, H), out_dtype),
                 jax.ShapeDtypeStruct((M, H), out_dtype))

    resident_w_bytes = 2 * 2 * _round_up(H, 8) * _round_up(H, 128) * 4
    use_ktiled = force_ktiled or resident_w_bytes > budget // 3
    if not use_ktiled:
        tm = _choose_row_tile(M, H, in_isz, out_isz, budget)
        if _resident_vmem_estimate(tm, H, in_isz, out_isz) > budget:
            use_ktiled = True

    if not use_ktiled:
        est = _resident_vmem_estimate(tm, H, in_isz, out_isz)
        vmem_limit = int(min(budget, max(est * 5 // 4 + (2 << 20), 16 << 20)))
        row_spec = pl.BlockSpec((tm, H), lambda i: (i, 0))
        w_spec = pl.BlockSpec((H, H), lambda i: (0, 0))
        b_spec = pl.BlockSpec((1, H), lambda i: (0, 0))
        out_sa, out_ga = pl.pallas_call(
            _faa_resident_kernel,
            out_shape=out_shape,
            grid=(pl.cdiv(M, tm),),
            in_specs=[row_spec, row_spec, row_spec,
                      w_spec, b_spec, w_spec, b_spec],
            out_specs=(row_spec, row_spec),
            compiler_params=pltpu.CompilerParams(
                dimension_semantics=("parallel",),
                vmem_limit_bytes=vmem_limit),
        )(xf, xsaf, xgaf, w_sa, b_sa2, w_ga, b_ga2)
    else:
        # Large HIDDEN_SIZE: K-tiled grid, bf16 weight K-slices streamed per k,
        # f32 VMEM accumulators, epilogue on the last k step.
        K_pad = _round_up(H, 128)
        tm, tk = _choose_ktiled_sizes(M, H, K_pad, in_isz, out_isz, budget, tile_k)
        est = _ktiled_vmem_estimate(tm, H, tk, in_isz, out_isz)
        vmem_limit = int(min(budget, max(est * 5 // 4 + (2 << 20), 16 << 20)))

        def pad_k(a):   # zero-pad the contraction dim only if H % 128 != 0
            return a if K_pad == H else jnp.pad(a, ((0, 0), (0, K_pad - H)))

        xk, xsak, xgak = pad_k(xf), pad_k(xsaf), pad_k(xgaf)
        w_sa_k = pad_k(w_sa.astype(jnp.bfloat16))   # stays in [out, in] layout
        w_ga_k = pad_k(w_ga.astype(jnp.bfloat16))

        row_spec = pl.BlockSpec((tm, tk), lambda i, k: (i, k))
        w_spec = pl.BlockSpec((H, tk), lambda i, k: (0, k))
        b_spec = pl.BlockSpec((1, H), lambda i, k: (0, 0))
        out_spec = pl.BlockSpec((tm, H), lambda i, k: (i, 0))
        # TODO(synk): add N (output-column) tiling for extreme HIDDEN_SIZE where
        # even a (tm=128, H) f32 accumulator pair no longer fits the VMEM budget.
        out_sa, out_ga = pl.pallas_call(
            _faa_ktiled_kernel,
            out_shape=out_shape,
            grid=(pl.cdiv(M, tm), K_pad // tk),
            in_specs=[row_spec, row_spec, row_spec,
                      w_spec, b_spec, w_spec, b_spec],
            out_specs=(out_spec, out_spec),
            scratch_shapes=[pltpu.VMEM((tm, H), jnp.float32),
                            pltpu.VMEM((tm, H), jnp.float32)],
            compiler_params=pltpu.CompilerParams(
                dimension_semantics=("parallel", "arbitrary"),
                vmem_limit_bytes=vmem_limit),
        )(xk, xsak, xgak, w_sa_k, b_sa2, w_ga_k, b_ga2)

    return out_sa.reshape(B, S, H), out_ga.reshape(B, S, H)


# ---------------------------------------------------------------------------
# Pure-JAX reference & test
# ---------------------------------------------------------------------------
def faa_reference(x, x_SA, x_GA, w_sa, b_sa, w_ga, b_ga):
    a = jax.nn.sigmoid((x * x_SA) @ w_sa.T + b_sa)
    g = jax.nn.sigmoid((x * x_GA) @ w_ga.T + b_ga)
    pair = jnp.stack([a, g], axis=-2)               # [B, S, 2, H]
    w = jax.nn.softmax(pair, axis=-2)
    return w[..., 0, :], w[..., 1, :]


def _make_inputs(key, B, S, H):
    ks = jax.random.split(key, 7)
    x = jax.random.normal(ks[0], (B, S, H), dtype=jnp.float32)
    x_SA = jax.random.normal(ks[1], (B, S, H), dtype=jnp.float32)
    x_GA = jax.random.normal(ks[2], (B, S, H), dtype=jnp.float32)
    # nn.Linear-style init (uniform in +/- 1/sqrt(H)); weights in [out, in] layout.
    lim = 1.0 / (H ** 0.5)
    w_sa = jax.random.uniform(ks[3], (H, H), jnp.float32, -lim, lim)
    b_sa = jax.random.uniform(ks[4], (H,), jnp.float32, -lim, lim)
    w_ga = jax.random.uniform(ks[5], (H, H), jnp.float32, -lim, lim)
    b_ga = jax.random.uniform(ks[6], (H,), jnp.float32, -lim, lim)
    return x, x_SA, x_GA, w_sa, b_sa, w_ga, b_ga


if __name__ == "__main__":
    key = jax.random.PRNGKey(0)

    # Primary small test (resident-weight path): batch=2, seq=8, HIDDEN_SIZE=32.
    args = _make_inputs(key, 2, 8, 32)
    out_sa, out_ga = faa_forward(*args)
    jax.block_until_ready((out_sa, out_ga))
    ref_sa, ref_ga = faa_reference(*args)
    assert out_sa.shape == ref_sa.shape and out_ga.shape == ref_ga.shape
    # bf16 MXU operands -> loosen tolerance vs the f32 reference.
    assert jnp.allclose(out_sa, ref_sa, atol=1e-2, rtol=1e-2)
    assert jnp.allclose(out_ga, ref_ga, atol=1e-2, rtol=1e-2)
    # The 2-way softmax weights must sum to 1 (exact with the sigmoid identity).
    assert jnp.allclose(out_sa + out_ga, jnp.ones_like(out_sa), atol=1e-5)

    # Secondary test: force the K-tiled large-HIDDEN_SIZE path with 2 k-steps
    # (H=256, tile_k=128) so the accumulate/finalize pipeline is also validated.
    args2 = _make_inputs(jax.random.fold_in(key, 1), 2, 8, 256)
    t_sa, t_ga = faa_forward(*args2, force_ktiled=True, tile_k=128)
    jax.block_until_ready((t_sa, t_ga))
    r_sa, r_ga = faa_reference(*args2)
    assert jnp.allclose(t_sa, r_sa, atol=2e-2, rtol=2e-2)
    assert jnp.allclose(t_ga, r_ga, atol=2e-2, rtol=2e-2)
    assert jnp.allclose(t_sa + t_ga, jnp.ones_like(t_sa), atol=1e-5)

    print("KERNEL_OK")
</pallas_src>

<mosaic_0001>
module attributes {stable_mosaic.version = 11 : i64} {
  func.func @_faa_resident_kernel(%arg0: i32, %arg1: memref<16x32xf32, #tpu.memory_space<vmem>>, %arg2: memref<16x32xf32, #tpu.memory_space<vmem>>, %arg3: memref<16x32xf32, #tpu.memory_space<vmem>>, %arg4: memref<32x32xf32, #tpu.memory_space<vmem>>, %arg5: memref<1x32xf32, #tpu.memory_space<vmem>>, %arg6: memref<32x32xf32, #tpu.memory_space<vmem>>, %arg7: memref<1x32xf32, #tpu.memory_space<vmem>>, %arg8: memref<16x32xf32, #tpu.memory_space<vmem>>, %arg9: memref<16x32xf32, #tpu.memory_space<vmem>>) attributes {dimension_semantics = [#tpu.dimension_semantics<parallel>], iteration_bounds = array<i64: 1>, scalar_prefetch = 0 : i64, scratch_operands = 0 : i64, tpu.core_type = #tpu.core_type<tc>, window_params = [{transform_indices = @transform_0, window_bounds = array<i64: 16, 32>}, {transform_indices = @transform_1, window_bounds = array<i64: 16, 32>}, {transform_indices = @transform_2, window_bounds = array<i64: 16, 32>}, {pipeline_mode = #tpu.pipeline_mode<synchronous>, transform_indices = @transform_3, window_bounds = array<i64: 32, 32>}, {pipeline_mode = #tpu.pipeline_mode<synchronous>, transform_indices = @transform_4, window_bounds = array<i64: 1, 32>}, {pipeline_mode = #tpu.pipeline_mode<synchronous>, transform_indices = @transform_5, window_bounds = array<i64: 32, 32>}, {pipeline_mode = #tpu.pipeline_mode<synchronous>, transform_indices = @transform_6, window_bounds = array<i64: 1, 32>}, {transform_indices = @transform_7, window_bounds = array<i64: 16, 32>}, {transform_indices = @transform_8, window_bounds = array<i64: 16, 32>}]} {
    %c0 = arith.constant 0 : index
    %c0_0 = arith.constant 0 : index
    %0 = vector.load %arg1[%c0, %c0_0] : memref<16x32xf32, #tpu.memory_space<vmem>>, vector<16x32xf32>
    %c0_1 = arith.constant 0 : index
    %c0_2 = arith.constant 0 : index
    %1 = vector.load %arg2[%c0_1, %c0_2] : memref<16x32xf32, #tpu.memory_space<vmem>>, vector<16x32xf32>
    %2 = arith.mulf %0, %1 : vector<16x32xf32>
    %3 = arith.truncf %2 : vector<16x32xf32> to vector<16x32xbf16>
    %c0_3 = arith.constant 0 : index
    %c0_4 = arith.constant 0 : index
    %4 = vector.load %arg3[%c0_3, %c0_4] : memref<16x32xf32, #tpu.memory_space<vmem>>, vector<16x32xf32>
    %5 = arith.mulf %0, %4 : vector<16x32xf32>
    %6 = arith.truncf %5 : vector<16x32xf32> to vector<16x32xbf16>
    %c0_5 = arith.constant 0 : index
    %c0_6 = arith.constant 0 : index
    %7 = vector.load %arg4[%c0_5, %c0_6] : memref<32x32xf32, #tpu.memory_space<vmem>>, vector<32x32xf32>
    %8 = arith.truncf %7 : vector<32x32xf32> to vector<32x32xbf16>
    %c0_7 = arith.constant 0 : index
    %c0_8 = arith.constant 0 : index
    %9 = vector.load %arg6[%c0_7, %c0_8] : memref<32x32xf32, #tpu.memory_space<vmem>>, vector<32x32xf32>
    %10 = arith.truncf %9 : vector<32x32xf32> to vector<32x32xbf16>
    %cst = arith.constant dense<0.000000e+00> : vector<16x32xf32>
    %11 = tpu.matmul %3, %8, %cst {dimension_numbers = #tpu.dot_dimension_numbers<[1], [1], [0], [0], [0, 0, 1, 0], [], []>} : vector<16x32xbf16>, vector<32x32xbf16>, vector<16x32xf32> -> vector<16x32xf32>
    %cst_9 = arith.constant dense<0.000000e+00> : vector<16x32xf32>
    %12 = tpu.matmul %6, %10, %cst_9 {dimension_numbers = #tpu.dot_dimension_numbers<[1], [1], [0], [0], [0, 0, 1, 0], [], []>} : vector<16x32xbf16>, vector<32x32xbf16>, vector<16x32xf32> -> vector<16x32xf32>
    %c0_10 = arith.constant 0 : index
    %c0_11 = arith.constant 0 : index
    %13 = vector.load %arg5[%c0_10, %c0_11] : memref<1x32xf32, #tpu.memory_space<vmem>>, vector<1x32xf32>
    %14 = vector.broadcast %13 : vector<1x32xf32> to vector<16x32xf32>
    %15 = arith.addf %11, %14 : vector<16x32xf32>
    %16 = arith.negf %15 : vector<16x32xf32>
    %17 = math.exp %16 : vector<16x32xf32>
    %cst_12 = arith.constant 1.000000e+00 : f32
    %18 = vector.broadcast %cst_12 : f32 to vector<16x32xf32>
    %19 = arith.addf %18, %17 : vector<16x32xf32>
    %20 = arith.divf %18, %19 : vector<16x32xf32>
    %c0_13 = arith.constant 0 : index
    %c0_14 = arith.constant 0 : index
    %21 = vector.load %arg7[%c0_13, %c0_14] : memref<1x32xf32, #tpu.memory_space<vmem>>, vector<1x32xf32>
    %22 = vector.broadcast %21 : vector<1x32xf32> to vector<16x32xf32>
    %23 = arith.addf %12, %22 : vector<16x32xf32>
    %24 = arith.negf %23 : vector<16x32xf32>
    %25 = math.exp %24 : vector<16x32xf32>
    %cst_15 = arith.constant 1.000000e+00 : f32
    %26 = vector.broadcast %cst_15 : f32 to vector<16x32xf32>
    %27 = arith.addf %26, %25 : vector<16x32xf32>
    %28 = arith.divf %26, %27 : vector<16x32xf32>
    %29 = arith.subf %20, %28 : vector<16x32xf32>
    %30 = arith.negf %29 : vector<16x32xf32>
    %31 = math.exp %30 : vector<16x32xf32>
    %cst_16 = arith.constant 1.000000e+00 : f32
    %32 = vector.broadcast %cst_16 : f32 to vector<16x32xf32>
    %33 = arith.addf %32, %31 : vector<16x32xf32>
    %34 = arith.divf %32, %33 : vector<16x32xf32>
    %c0_17 = arith.constant 0 : index
    %c0_18 = arith.constant 0 : index
    %35 = vector.load %arg8[%c0_17, %c0_18] : memref<16x32xf32, #tpu.memory_space<vmem>>, vector<16x32xf32>
    tpu.vector_store %arg8[%c0_17, %c0_18], %34 {strides = array<i32>} : memref<16x32xf32, #tpu.memory_space<vmem>>, vector<16x32xf32>,
    %cst_19 = arith.constant 1.000000e+00 : f32
    %36 = vector.broadcast %cst_19 : f32 to vector<16x32xf32>
    %37 = arith.subf %36, %34 : vector<16x32xf32>
    %c0_20 = arith.constant 0 : index
    %c0_21 = arith.constant 0 : index
    %38 = vector.load %arg9[%c0_20, %c0_21] : memref<16x32xf32, #tpu.memory_space<vmem>>, vector<16x32xf32>
    tpu.vector_store %arg9[%c0_20, %c0_21], %37 {strides = array<i32>} : memref<16x32xf32, #tpu.memory_space<vmem>>, vector<16x32xf32>,
    return
  }
  func.func @transform_0(%arg0: i32) -> (i32, i32) {
    %c0_i32 = arith.constant 0 : i32
    %c0_i32_0 = arith.constant 0 : i32
    return %arg0, %c0_i32 : i32, i32
  }
  func.func @transform_1(%arg0: i32) -> (i32, i32) {
    %c0_i32 = arith.constant 0 : i32
    %c0_i32_0 = arith.constant 0 : i32
    return %arg0, %c0_i32 : i32, i32
  }
  func.func @transform_2(%arg0: i32) -> (i32, i32) {
    %c0_i32 = arith.constant 0 : i32
    %c0_i32_0 = arith.constant 0 : i32
    return %arg0, %c0_i32 : i32, i32
  }
  func.func @transform_3(%arg0: i32) -> (i32, i32) {
    %c0_i32 = arith.constant 0 : i32
    %c0_i32_0 = arith.constant 0 : i32
    %c0_i32_1 = arith.constant 0 : i32
    return %c0_i32, %c0_i32_0 : i32, i32
  }
  func.func @transform_4(%arg0: i32) -> (i32, i32) {
    %c0_i32 = arith.constant 0 : i32
    %c0_i32_0 = arith.constant 0 : i32
    %c0_i32_1 = arith.constant 0 : i32
    return %c0_i32, %c0_i32_0 : i32, i32
  }
  func.func @transform_5(%arg0: i32) -> (i32, i32) {
    %c0_i32 = arith.constant 0 : i32
    %c0_i32_0 = arith.constant 0 : i32
    %c0_i32_1 = arith.constant 0 : i32
    return %c0_i32, %c0_i32_0 : i32, i32
  }
  func.func @transform_6(%arg0: i32) -> (i32, i32) {
    %c0_i32 = arith.constant 0 : i32
    %c0_i32_0 = arith.constant 0 : i32
    %c0_i32_1 = arith.constant 0 : i32
    return %c0_i32, %c0_i32_0 : i32, i32
  }
  func.func @transform_7(%arg0: i32) -> (i32, i32) {
    %c0_i32 = arith.constant 0 : i32
    %c0_i32_0 = arith.constant 0 : i32
    return %arg0, %c0_i32 : i32, i32
  }
  func.func @transform_8(%arg0: i32) -> (i32, i32) {
    %c0_i32 = arith.constant 0 : i32
    %c0_i32_0 = arith.constant 0 : i32
    return %arg0, %c0_i32 : i32, i32
  }
}

</mosaic_0001>

<bundles_post_ra>
// kernel: tpu_custom_call.1
= control target key start
LH: loop header
LB: loop body
LE: loop exit
PB: predicated region body
PF: predicated region fallthrough
CT: control target
= control target key end

     0   :  { %14 = vsyncpa [#allocation3], 0  ;;  %s682_s0 = inlined_call_operand.hbm [shape: f32[16,32], index: 0, kind: input, shape index: {}]   ;;  %s683_s1 = inlined_call_operand.hbm [shape: f32[16,32], index: 1, kind: input, shape index: {}]   ;;  %s684_s2 = inlined_call_operand.hbm [shape: f32[16,32], index: 2, kind: input, shape index: {}]   ;;  %s685_s3 = inlined_call_operand.hbm [shape: f32[32,32], index: 3, kind: input, shape index: {}]   ;;  %s686_s4 = inlined_call_operand.vmem [shape: f32[1,32], index: 4, kind: input, shape index: {}]   ;;  %s687_s5 = inlined_call_operand.hbm [shape: f32[32,32], index: 5, kind: input, shape index: {}]   ;;  %s688_s6 = inlined_call_operand.vmem [shape: f32[1,32], index: 6, kind: input, shape index: {}]   ;;  %s689_s7 = inlined_call_operand.hbm [shape: f32[16,32], index: 7, kind: output, shape index: {0}]   ;;  %s690_s8 = inlined_call_operand.hbm [shape: f32[16,32], index: 8, kind: output, shape index: {1}]  }
   0x1   :  { %15 = vsyncpa [#allocation6], 0 }
   0x2   :  { %16 = vsyncpa [#allocation9], 0 }
   0x3   :  { %17 = vsyncpa [#allocation4], 0 }
   0x4   :  { %18 = vsyncpa [#allocation13], 0  ;;  %s36_s29 = sshll.u32 %s683_s1, 4  ;;  %s570_s30 = smov [#allocation5]   ;;  %s37_s29 = int_to_ptr.hbm [resolvable:$true] %s36_s29 }
   0x5   :  { %s38_s9 = sshll.u32 %s570_s30, 4  ;;  %s62_s12 = sshll.u32 %s685_s3, 4  ;;  %s39_s9 = int_to_ptr.vmem [resolvable:$true] %s38_s9  ;;  %s63_s12 = int_to_ptr.hbm [resolvable:$true] %s62_s12 }
   0x6   :  { %s571_s13 = smov 128   ;;  %s572_s14 = smov 8  }
   0x7   :  { %44 = dma.hbm_to_vmem [thread:$0]  %s37_s29, 256, %s39_s9, [#allocation6], %s571_s13, %s571_s13, %s572_s14  }
   0x8   :  { %s573_s15 = smov [#allocation8]   ;;  %s23_s1 = sshll.u32 %s682_s0, 4  ;;  %s24_s1 = int_to_ptr.hbm [resolvable:$true] %s23_s1 }
   0x9   :  { %s64_s16 = sshll.u32 %s573_s15, 4  ;;  %s49_s20 = sshll.u32 %s684_s2, 4  ;;  %s65_s16 = int_to_ptr.vmem [resolvable:$true] %s64_s16  ;;  %s50_s20 = int_to_ptr.hbm [resolvable:$true] %s49_s20 }
   0xa   :  { %70 = dma.hbm_to_vmem [thread:$0]  %s63_s12, 512, %s65_s16, [#allocation9], %s571_s13, %s571_s13, %s572_s14  }
   0xb   :  { %s574_s21 = smov [#allocation2]   ;;  %s575_s23 = smov [#allocation7]  }
   0xc   :  { %s25_s22 = sshll.u32 %s574_s21, 4  ;;  %s51_s0 = sshll.u32 %s575_s23, 4  ;;  %s26_s22 = int_to_ptr.vmem [resolvable:$true] %s25_s22  ;;  %s52_s0 = int_to_ptr.vmem [resolvable:$true] %s51_s0 }
   0xd   :  { %31 = dma.hbm_to_vmem [thread:$0]  %s24_s1, 256, %s26_s22, [#allocation3], %s571_s13, %s571_s13, %s572_s14  }
   0xe   :  { %s77_s26 = sshll.u32 %s687_s5, 4  ;;  %s576_s2 = smov [#allocation10]   ;;  %s78_s26 = int_to_ptr.hbm [resolvable:$true] %s77_s26 }
   0xf   :  { %57 = dma.hbm_to_vmem [thread:$0]  %s50_s20, 256, %s52_s0, [#allocation6], %s571_s13, %s571_s13, %s572_s14  }
  0x10   :  { %s79_s27 = sshll.u32 %s576_s2, 4  ;;  %s80_s27 = int_to_ptr.vmem [resolvable:$true] %s79_s27 }
  0x11   :  { %85 = dma.hbm_to_vmem [thread:$0]  %s78_s26, 512, %s80_s27, [#allocation9], %s571_s13, %s571_s13, %s572_s14  }
  0x12   :  { %560 = dma.done.wait [#allocation3], 256  }
  0x13   :  { %561 = vsyncadd [#allocation3], 4294967040 }
  0x14   :  { %562 = dma.done.wait [#allocation6], 512  }
  0x15   :  { %563 = vsyncadd [#allocation6], 4294966784 }
  0x16   :  { %564 = dma.done.wait [#allocation9], 1024  }
  0x17   :  { %565 = vsyncadd [#allocation9], 4294966272  ;;  %v123_v0 = vld [vmem:[#allocation8 + $0x10] sm:$0xff]  ;;  %v124_v1 = vld [vmem:[#allocation8 + $0x18] sm:$0xff]  ;;  %vm137_vm0 = vcmask 261120   ;;  %s316_s11 = sshll.u32 %s689_s7, 4  ;;  %s317_s11 = int_to_ptr.hbm [resolvable:$true] %s316_s11 }
  0x18   :  { %v129_v2 = vld [vmem:[#allocation10 + $0x10] sm:$0xff]  ;;  %v126_v3 = vpack.c.bf16 %v124_v1, %v123_v0  ;;  %v130_v4 = vld [vmem:[#allocation10 + $0x18] sm:$0xff]  ;;  %v121_v6 = vld [vmem:[#allocation8] sm:$0xff]  ;;  %s578_s12 = smov [#allocation12]   ;;  %s329_s18 = sshll.u32 %s690_s8, 4  ;;  %s330_s18 = int_to_ptr.hbm [resolvable:$true] %s329_s18 }
  0x19   :  { %v132_v5 = vpack.c.bf16 %v130_v4, %v129_v2  ;;  %v122_v7 = vld [vmem:[#allocation8 + $0x8] sm:$0xff]  ;;  %v127_v9 = vld [vmem:[#allocation10] sm:$0xff]  ;;  %v109_v14 = vld [vmem:[#allocation2] sm:$0xff]  ;;  %s327_s15 = sshll.u32 %s578_s12, 4  ;;  %s328_s15 = int_to_ptr.vmem [resolvable:$true] %s327_s15 }
  0x1a   :  { %v145_v8 = vsel %vm137_vm0, %v126_v3, 0  ;;  %v128_v10 = vld [vmem:[#allocation10 + $0x8] sm:$0xff]  ;;  %v125_v12 = vpack.c.bf16 %v122_v7, %v121_v6  ;;  %v110_v15 = vld [vmem:[#allocation2 + $0x8] sm:$0xff]  ;;  %v111_v16 = vld [vmem:[#allocation5] sm:$0xff] }
  0x1b   :  { %153 = vmatpush.bf16.xpose.msra.mxu0 %v145_v8  ;;  %v210_v11 = vsel %vm137_vm0, %v132_v5, 0  ;;  %v131_v13 = vpack.c.bf16 %v128_v10, %v127_v9  ;;  %v112_v17 = vld [vmem:[#allocation5 + $0x8] sm:$0xff]  ;;  %v116_v19 = vld [vmem:[#allocation7] sm:$0xff]  ;;  %v117_v20 = vld [vmem:[#allocation7 + $0x8] sm:$0xff]  ;;  %v113_v22 = vmul.f32 %v111_v16, %v109_v14 }
  0x1c   :  { %218 = vmatpush.bf16.xpose.msra.mxu1 %v210_v11  ;;  %v142_v18 = vsel %vm137_vm0, %v125_v12, 0  ;;  %v114_v23 = vmul.f32 %v112_v17, %v110_v15  ;;  %v118_v24 = vmul.f32 %v116_v19, %v109_v14  ;;  %v119_v25 = vmul.f32 %v117_v20, %v110_v15  ;;  %v366_v28 = vld [vmem:[%s686_s4] ss:$0 sm:$0xff]  ;;  %s577_s4 = smov [#allocation11]  }
  0x1d   :  { %v207_v21 = vsel %vm137_vm0, %v131_v13, 0  ;;  %v367_v29 = vld [vmem:[%s688_s6] ss:$0 sm:$0xff]  ;;  %s314_s6 = sshll.u32 %s577_s4, 4  ;;  %s315_s6 = int_to_ptr.vmem [resolvable:$true] %s314_s6 }
  0x1e   :  { %v115_v26 = vpack.c.bf16 %v114_v23, %v113_v22  ;;  %v120_v27 = vpack.c.bf16 %v119_v25, %v118_v24 }
  0x23   :  { %154 = vmatpush.bf16.xpose.msra.mxu0 %v142_v18 }
  0x24   :  { %219 = vmatpush.bf16.xpose.msra.mxu1 %v207_v21 }
  0x2a   :  { %349 = vmatmul.msk.bf16.vlgmr.msra.gmra.mxu0 %vm137_vm0, %v115_v26 }
  0x2b   :  { %352 = vmatmul.msk.bf16.vlgmr.msra.gmra.mxu1 %vm137_vm0, %v120_v27 }
  0xa7   :  { %v156_v30 = vpop.f32.mrf.mxu0 }
  0xa8   :  { %v157_v31 = vadd.f32 %v366_v28, %v156_v30  ;;  %v221_v32 = vpop.f32.mrf.mxu1 }
  0xa9   :  { %v222_v33 = vadd.f32 %v367_v29, %v221_v32 }
  0xaa   :  { %v350_v34 = vmul.f32 -1.442695, %v157_v31 }
  0xab   :  { %v353_v35 = vmul.f32 -1.442695, %v222_v33 }
  0xac   :  { %368 = vpow2.f32 %v350_v34 }
  0xad   :  { %370 = vpow2.f32 %v353_v35 }
  0xaf   :  { %v158_v36 = vpop.f32.mrf.mxu0 }
  0xb0   :  { %v159_v37 = vadd.f32 %v366_v28, %v158_v36  ;;  %v223_v38 = vpop.f32.mrf.mxu1 }
  0xb1   :  { %v224_v39 = vadd.f32 %v367_v29, %v223_v38 }
  0xb2   :  { %v369_v40 = vpop.eup %368  ;;  %v351_v41 = vmul.f32 -1.442695, %v159_v37 }
  0xb3   :  { %v371_v42 = vpop.eup %370  ;;  %v167_v43 = vadd.f32 1.0, %v369_v40  ;;  %v354_v44 = vmul.f32 -1.442695, %v224_v39 }
  0xb4   :  { %v232_v45 = vadd.f32 1.0, %v371_v42  ;;  %372 = vpow2.f32 %v351_v41 }
  0xb5   :  { %374 = vrcp.f32 %v167_v43  ;;  %v178_v55 = vand.u32 2147483647, %v167_v43  ;;  %v180_v56 = vand.u32 2147483648, %v167_v43  ;;  %vm174_vm3 = vweird.f32 %v167_v43 }
  0xb6   :  { %376 = vrcp.f32 %v232_v45  ;;  %v245_v59 = vand.u32 2147483648, %v232_v45  ;;  %v243_v61 = vand.u32 2147483647, %v232_v45  ;;  %vm239_vm5 = vweird.f32 %v232_v45 }
  0xb7   :  { %378 = vpow2.f32 %v354_v44  ;;  %v181_v0 = vor.u32 1.1754944e-38, %v180_v56  ;;  %vm179_vm6 = vcmp.eq.f32.partialorder %v178_v55, 8.507059e+37 }
  0xb8   :  { %v246_v3 = vor.u32 1.1754944e-38, %v245_v59  ;;  %vm244_vm8 = vcmp.eq.f32.partialorder %v243_v61, 8.507059e+37 }
  0xba   :  { %v373_v46 = vpop.eup %372 }
  0xbb   :  { %v375_v47 = vpop.eup %374  ;;  %v168_v48 = vadd.f32 1.0, %v373_v46 }
  0xbc   :  { %v377_v49 = vpop.eup %376  ;;  %v170_v50 = vmul.f32 %v375_v47, %v167_v43  ;;  %vm175_vm1 = vweird.f32 %v375_v47 }
  0xbd   :  { %v379_v51 = vpop.eup %378  ;;  %v235_v52 = vmul.f32 %v377_v49, %v232_v45  ;;  %380 = vrcp.f32 %v168_v48  ;;  %vm240_vm2 = vweird.f32 %v377_v49  ;;  %vm176_vm4 = vmor %vm174_vm3, %vm175_vm1  ;;  %v195_v13 = vand.u32 2147483648, %v168_v48 }
  0xbe   :  { %v171_v53 = vsub.f32 1.0, %v170_v50  ;;  %v233_v54 = vadd.f32 1.0, %v379_v51  ;;  %vm241_vm7 = vmor %vm239_vm5, %vm240_vm2  ;;  %v193_v15 = vand.u32 2147483647, %v168_v48  ;;  %vm189_vm10 = vweird.f32 %v168_v48 }
  0xbf   :  { %v236_v57 = vsub.f32 1.0, %v235_v52  ;;  %v196_v22 = vor.u32 1.1754944e-38, %v195_v13 }
  0xc0   :  { %v172_v58 = vmul.f32 %v375_v47, %v171_v53  ;;  %382 = vrcp.f32 %v233_v54  ;;  %v260_v18 = vand.u32 2147483648, %v233_v54  ;;  %v258_v20 = vand.u32 2147483647, %v233_v54 }
  0xc1   :  { %v237_v60 = vmul.f32 %v377_v49, %v236_v57  ;;  %vm194_vm13 = vcmp.eq.f32.partialorder %v193_v15, 8.507059e+37  ;;  %vm254_vm14 = vweird.f32 %v233_v54 }
  0xc2   :  { %v173_v62 = vadd.f32 %v375_v47, %v172_v58  ;;  %v261_v25 = vor.u32 1.1754944e-38, %v260_v18  ;;  %vm259_vm1 = vcmp.eq.f32.partialorder %v258_v20, 8.507059e+37 }
  0xc3   :  { %v381_v63 = vpop.eup %380  ;;  %v238_v1 = vadd.f32 %v377_v49, %v237_v60 }
  0xc4   :  { %v177_v2 = vsel %vm176_vm4, %v375_v47, %v173_v62  ;;  %v185_v4 = vmul.f32 %v381_v63, %v168_v48  ;;  %vm190_vm9 = vweird.f32 %v381_v63 }
  0xc5   :  { %v182_v5 = vsel %vm179_vm6, %v181_v0, %v177_v2  ;;  %v242_v6 = vsel %vm241_vm7, %v377_v49, %v238_v1  ;;  %vm191_vm11 = vmor %vm189_vm10, %vm190_vm9 }
  0xc6   :  { %v383_v7 = vpop.eup %382  ;;  %v247_v8 = vsel %vm244_vm8, %v246_v3, %v242_v6  ;;  %v186_v9 = vsub.f32 1.0, %v185_v4 }
  0xc7   :  { %v264_v10 = vsub.f32 %v182_v5, %v247_v8  ;;  %v250_v11 = vmul.f32 %v383_v7, %v233_v54  ;;  %vm255_vm12 = vweird.f32 %v383_v7 }
  0xc8   :  { %v187_v12 = vmul.f32 %v381_v63, %v186_v9  ;;  %vm256_vm15 = vmor %vm254_vm14, %vm255_vm12 }
  0xc9   :  { %v355_v14 = vmul.f32 -1.442695, %v264_v10  ;;  %v251_v16 = vsub.f32 1.0, %v250_v11 }
  0xca   :  { %v188_v17 = vadd.f32 %v381_v63, %v187_v12 }
  0xcb   :  { %384 = vpow2.f32 %v355_v14  ;;  %v252_v19 = vmul.f32 %v383_v7, %v251_v16 }
  0xcc   :  { %v192_v21 = vsel %vm191_vm11, %v381_v63, %v188_v17 }
  0xcd   :  { %v253_v23 = vadd.f32 %v383_v7, %v252_v19  ;;  %v197_v24 = vsel %vm194_vm13, %v196_v22, %v192_v21 }
  0xcf   :  { %v257_v26 = vsel %vm256_vm15, %v383_v7, %v253_v23 }
  0xd0   :  { %v262_v27 = vsel %vm259_vm1, %v261_v25, %v257_v26 }
  0xd1   :  { %v385_v28 = vpop.eup %384  ;;  %v265_v29 = vsub.f32 %v197_v24, %v262_v27 }
  0xd2   :  { %v272_v30 = vadd.f32 1.0, %v385_v28 }
  0xd3   :  { %v356_v31 = vmul.f32 -1.442695, %v265_v29 }
  0xd4   :  { %386 = vrcp.f32 %v272_v30  ;;  %v285_v37 = vand.u32 2147483648, %v272_v30  ;;  %v283_v39 = vand.u32 2147483647, %v272_v30  ;;  %vm279_vm3 = vweird.f32 %v272_v30 }
  0xd5   :  { %388 = vpow2.f32 %v356_v31 }
  0xd6   :  { %v286_v41 = vor.u32 1.1754944e-38, %v285_v37  ;;  %vm284_vm5 = vcmp.eq.f32.partialorder %v283_v39, 8.507059e+37 }
  0xda   :  { %v387_v32 = vpop.eup %386 }
  0xdb   :  { %v389_v33 = vpop.eup %388  ;;  %v275_v34 = vmul.f32 %v387_v32, %v272_v30  ;;  %vm280_vm2 = vweird.f32 %v387_v32 }
  0xdc   :  { %v273_v35 = vadd.f32 1.0, %v389_v33  ;;  %vm281_vm4 = vmor %vm279_vm3, %vm280_vm2 }
  0xdd   :  { %v276_v36 = vsub.f32 1.0, %v275_v34 }
  0xde   :  { %390 = vrcp.f32 %v273_v35  ;;  %v300_v48 = vand.u32 2147483648, %v273_v35  ;;  %v298_v50 = vand.u32 2147483647, %v273_v35  ;;  %vm294_vm7 = vweird.f32 %v273_v35 }
  0xdf   :  { %v277_v38 = vmul.f32 %v387_v32, %v276_v36 }
  0xe0   :  { %v301_v52 = vor.u32 1.1754944e-38, %v300_v48  ;;  %vm299_vm9 = vcmp.eq.f32.partialorder %v298_v50, 8.507059e+37 }
  0xe1   :  { %v278_v40 = vadd.f32 %v387_v32, %v277_v38 }
  0xe3   :  { %v282_v42 = vsel %vm281_vm4, %v387_v32, %v278_v40 }
  0xe4   :  { %v391_v43 = vpop.eup %390  ;;  %v287_v44 = vsel %vm284_vm5, %v286_v41, %v282_v42 }
  0xe5   :  { %v290_v45 = vmul.f32 %v391_v43, %v273_v35  ;;  %304 = vst.msk [vmem:[#allocation11] sm:$0xff] %vm137_vm0, %v287_v44  ;;  %v306_v46 = vsub.f32 1.0, %v287_v44  ;;  %vm295_vm6 = vweird.f32 %v391_v43 }
  0xe6   :  { %vm296_vm8 = vmor %vm294_vm7, %vm295_vm6 }
  0xe7   :  { %v291_v47 = vsub.f32 1.0, %v290_v45  ;;  %308 = vst.msk [vmem:[#allocation12] sm:$0xff] %vm137_vm0, %v306_v46 }
  0xe9   :  { %v292_v49 = vmul.f32 %v391_v43, %v291_v47 }
  0xeb   :  { %v293_v51 = vadd.f32 %v391_v43, %v292_v49 }
  0xed   :  { %v297_v53 = vsel %vm296_vm8, %v391_v43, %v293_v51 }
  0xee   :  { %v302_v54 = vsel %vm299_vm9, %v301_v52, %v297_v53 }
  0xef   :  { %305 = vst.msk [vmem:[#allocation11 + $0x8] sm:$0xff] %vm137_vm0, %v302_v54  ;;  %v307_v55 = vsub.f32 1.0, %v302_v54 }
  0xf0   :  { %322 = dma.vmem_to_hbm [thread:$0]  %s315_s6, 256, %s317_s11, [#allocation4], %s571_s13, %s571_s13, %s572_s14  }
  0xf1   :  { %309 = vst.msk [vmem:[#allocation12 + $0x8] sm:$0xff] %vm137_vm0, %v307_v55 }
  0xf2   :  { %335 = dma.vmem_to_hbm [thread:$0]  %s328_s15, 256, %s330_s18, [#allocation13], %s571_s13, %s571_s13, %s572_s14  }
  0xf3   :  { %566 = dma.done.wait [#allocation4], 256  }
  0xf4   :  { %567 = vsyncadd [#allocation4], 4294967040 }
  0xf5   :  { %568 = dma.done.wait [#allocation13], 256  }
  0xf6   :  { %569 = vsyncadd [#allocation13], 4294967040 }
  0xf7   :  { %344 = vsyncpa [#allocation3], 1 }
  0xf8   :  { %345 = vsyncpa [#allocation6], 1 }
  0xf9   :  { %346 = vsyncpa [#allocation9], 1 }
  0xfa   :  { %347 = vsyncpa [#allocation4], 1 }
  0xfb   :  { %348 = vsyncpa [#allocation13], 1 }

</bundles_post_ra>
